<compile_context>
chip_gen: v7x
topology: tpu7x:2x2x1
jax: 0.10.0
libtpu: 0.0.40
codegen_flags: <defaults>
</compile_context>

<pallas_src>
import jax
import jax.numpy as jnp
from jax.experimental import pallas as pl
from jax.experimental.pallas import tpu as pltpu

IN_F = 512
HID_F = 256
OUT_F = 512


def mlp_kernel(x_ref, w_ref, o_ref):
    # x_ref: (Bp, 512)  bf16 VMEM
    # w_ref: (512, 512) bf16 VMEM  (= W1^T @ W2^T, precombined)
    # o_ref: (Bp, 512)  f32  VMEM
    o_ref[...] = jnp.dot(
        x_ref[...], w_ref[...], preferred_element_type=jnp.float32
    ).astype(o_ref.dtype)


def prepare_params(w1, w2):
    """One-time parameter prep (hoisted out of the forward path).

    w1: (256, 512) f32  -- PyTorch `linear.weight`
    w2: (512, 256) f32  -- PyTorch `output.weight`
    Returns the combined (512, 512) bf16 weight such that
    forward(x) == x @ w_combined (up to bf16 rounding).
    """
    w_combined = jnp.dot(
        w1.T.astype(jnp.float32), w2.T.astype(jnp.float32)
    )  # (512, 512) f32, combined once in full precision
    return w_combined.astype(jnp.bfloat16)


def mlp_forward(x, w_combined):
    """x: (B, 512) f32, w_combined: (512, 512) bf16 from prepare_params()."""
    B = x.shape[0]
    Bp = max(8, ((B + 7) // 8) * 8)  # sublane-align the batch dimension

    x_b = x.astype(jnp.bfloat16)
    if Bp != B:
        x_b = jnp.pad(x_b, ((0, Bp - B), (0, 0)))

    out = pl.pallas_call(
        mlp_kernel,
        out_shape=jax.ShapeDtypeStruct((Bp, OUT_F), jnp.float32),
        in_specs=[
            pl.BlockSpec(memory_space=pltpu.MemorySpace.VMEM),
            pl.BlockSpec(memory_space=pltpu.MemorySpace.VMEM),
        ],
        out_specs=pl.BlockSpec(memory_space=pltpu.MemorySpace.VMEM),
    )(x_b, w_combined)

    return out[:B]


if __name__ == "__main__":
    key = jax.random.PRNGKey(0)
    kx, k1, k2 = jax.random.split(key, 3)

    # Example input matching M.example_inputs(): (1, 512) float32.
    x = jax.random.normal(kx, (1, IN_F), dtype=jnp.float32)

    # Deterministic "Kaiming-uniform-like" init matching PyTorch Linear shapes:
    #   linear.weight: (256, 512), output.weight: (512, 256)
    bound1 = 1.0 / (IN_F ** 0.5)
    bound2 = 1.0 / (HID_F ** 0.5)
    w1 = jax.random.uniform(k1, (HID_F, IN_F), jnp.float32, -bound1, bound1)
    w2 = jax.random.uniform(k2, (OUT_F, HID_F), jnp.float32, -bound2, bound2)

    # One-time param prep (combined bf16 weight), then the Pallas forward.
    w_combined = prepare_params(w1, w2)
    out = mlp_forward(x, w_combined)
    out = jax.block_until_ready(out)

    # Reference check in plain f32 JAX (same math as the PyTorch module).
    # Tolerance loosened for bf16 weights/activations.
    ref = (x @ w1.T) @ w2.T
    assert out.shape == (1, OUT_F), out.shape
    assert jnp.allclose(out, ref, atol=3e-2, rtol=3e-2), "mismatch vs reference"

    print("KERNEL_OK")
</pallas_src>

<mosaic_0001>
module attributes {stable_mosaic.version = 11 : i64} {
  func.func @mlp_kernel(%arg0: memref<8x512xbf16, #tpu.memory_space<vmem>>, %arg1: memref<512x512xbf16, #tpu.memory_space<vmem>>, %arg2: memref<8x512xf32, #tpu.memory_space<vmem>>) attributes {dimension_semantics = [], scalar_prefetch = 0 : i64, scratch_operands = 0 : i64, tpu.core_type = #tpu.core_type<tc>} {
    %c0 = arith.constant 0 : index
    %c0_0 = arith.constant 0 : index
    %0 = vector.load %arg0[%c0, %c0_0] : memref<8x512xbf16, #tpu.memory_space<vmem>>, vector<8x512xbf16>
    %c0_1 = arith.constant 0 : index
    %c0_2 = arith.constant 0 : index
    %1 = vector.load %arg1[%c0_1, %c0_2] : memref<512x512xbf16, #tpu.memory_space<vmem>>, vector<512x512xbf16>
    %cst = arith.constant dense<0.000000e+00> : vector<8x512xf32>
    %2 = tpu.matmul %0, %1, %cst {dimension_numbers = #tpu.dot_dimension_numbers<[1], [0], [0], [1], [0, 0, 1, 1], [], []>} : vector<8x512xbf16>, vector<512x512xbf16>, vector<8x512xf32> -> vector<8x512xf32>
    %c0_3 = arith.constant 0 : index
    %c0_4 = arith.constant 0 : index
    %3 = vector.load %arg2[%c0_3, %c0_4] : memref<8x512xf32, #tpu.memory_space<vmem>>, vector<8x512xf32>
    tpu.vector_store %arg2[%c0_3, %c0_4], %2 {strides = array<i32>} : memref<8x512xf32, #tpu.memory_space<vmem>>, vector<8x512xf32>,
    return
  }
}

</mosaic_0001>

<bundles_post_ra>
// kernel: tpu_custom_call.1
= control target key start
LH: loop header
LB: loop body
LE: loop exit
PB: predicated region body
PF: predicated region fallthrough
CT: control target
= control target key end

     0   :  { %7 = vsyncpa [#allocation3], 0  ;;  %s1488_s0 = inlined_call_operand.hbm [shape: bf16[8,512], index: 0, kind: input, shape index: {}]   ;;  %s1489_s1 = inlined_call_operand.hbm [shape: bf16[512,512], index: 1, kind: input, shape index: {}]   ;;  %s1490_s2 = inlined_call_operand.hbm [shape: f32[8,512], index: 2, kind: output, shape index: {}]  }
   0x1   :  { %8 = vsyncpa [#allocation6], 0 }
   0x2   :  { %9 = vsyncpa [#allocation4], 0  ;;  %s1419_s9 = smov [#allocation2]   ;;  %s1420_s11 = smov [#allocation5]  }
   0x3   :  { %s16_s10 = sshll.u32 %s1419_s9, 4  ;;  %s25_s12 = sshll.u32 %s1420_s11, 4  ;;  %s17_s10 = int_to_ptr.vmem [resolvable:$true] %s16_s10  ;;  %s1439_s12 = int_to_ptr.vmem [resolvable:$true] %s25_s12 }
   0x4   :  { %s1347_s15 = scalar_lea.hbm %s1488_s0, 256 }
   0x5   :  { %p1348_p0 = scmp.ne.s32.totalorder %s1488_s0, %s1347_s15  ;;  %p1351_p1 = scmp.lt.u32.totalorder %s1347_s15, %s1488_s0 }
   0x7   :  { %p1353_p2 = pnand %p1351_p1, %p1348_p0 }
   0x9   :  { %1356 = shalt.err (!%p1353_p2)
}
   0xa   :  { %s1357_s20 = scalar_lea.vmem %s17_s10, 256  ;;  %p1362_p4 = scmp.lt.s32.totalorder %s17_s10, %s17_s10 }
   0xb   :  { %p1358_p3 = scmp.ne.s32.totalorder %s17_s10, %s1357_s20  ;;  %p1363_p5 = scmp.lt.s32.totalorder %s1357_s20, %s1357_s20 }
   0xd   :  { %p1364_p6 = por %p1363_p5, %p1362_p4 }
   0xf   :  { %p1365_p7 = pnand %p1364_p6, %p1358_p3 }
  0x11   :  { %1368 = shalt.err (!%p1365_p7)
}
  0x12   :  { %19 = dma.hbm_to_vmem [thread:$0]  %s1488_s0, 256, %s17_s10, [#allocation3]  }
  0x13   :  { %s1369_s25 = scalar_lea.hbm %s1489_s1, 16384 }
  0x14   :  { %p1370_p8 = scmp.ne.s32.totalorder %s1489_s1, %s1369_s25  ;;  %p1373_p9 = scmp.lt.u32.totalorder %s1369_s25, %s1489_s1 }
  0x16   :  { %p1375_p10 = pnand %p1373_p9, %p1370_p8 }
  0x18   :  { %1378 = shalt.err (!%p1375_p10)
}
  0x19   :  { %s1379_s30 = scalar_lea.vmem %s1439_s12, 16384  ;;  %p1384_p12 = scmp.lt.s32.totalorder %s1439_s12, %s1439_s12 }
  0x1a   :  { %p1380_p11 = scmp.ne.s32.totalorder %s1439_s12, %s1379_s30  ;;  %p1385_p13 = scmp.lt.s32.totalorder %s1379_s30, %s1379_s30 }
  0x1c   :  { %p1386_p0 = por %p1385_p13, %p1384_p12 }
  0x1e   :  { %p1387_p1 = pnand %p1386_p0, %p1380_p11 }
  0x20   :  { %1390 = shalt.err (!%p1387_p1)
}
  0x21   :  { %s1421_s0 = smov 256   ;;  %s1422_s3 = smov 16  }
  0x22   :  { %31 = dma.hbm_to_vmem [thread:$0]  %s1489_s1, 16384, %s1439_s12, [#allocation6], %s1421_s0, %s1421_s0, %s1422_s3  }
  0x23   :  { %1413 = dma.done.wait [#allocation3], 256  }
  0x24   :  { %1414 = vsyncadd [#allocation3], 4294967040 }
  0x25   :  { %1415 = dma.done.wait [#allocation6], 16384  }
  0x26   :  { %1416 = vsyncadd [#allocation6], 4294950912  ;;  %v1151_v0 = vld [vmem:[#allocation5 + $0x4] ss:$16 sps:$4 sm:$0xff]   ;;  %v1153_v1 = vld [vmem:[#allocation5 + $0xc] ss:$16 sps:$4 sm:$0xff]  }
  0x27   :  { %822 = vmatprep.subr.bf16.mxu0 %v1151_v0  ;;  %v1155_v2 = vld [vmem:[#allocation5] ss:$16 sps:$4 sm:$0xff]   ;;  %v1156_v3 = vld [vmem:[#allocation5 + $0x8] ss:$16 sps:$4 sm:$0xff]   ;;  %904 = vmatprep.subr.bf16.mxu1 %v1153_v1  ;;  %v1157_v4 = vld [vmem:[#allocation5 + $0x24] ss:$16 sps:$4 sm:$0xff]  }
  0x28   :  { %823 = vmatpush1.bf16.msra.mxu0 %v1155_v2  ;;  %905 = vmatpush1.bf16.msra.mxu1 %v1156_v3  ;;  %v1159_v5 = vld [vmem:[#allocation5 + $0x2c] ss:$16 sps:$4 sm:$0xff]   ;;  %v1161_v6 = vld [vmem:[#allocation5 + $0x20] ss:$16 sps:$4 sm:$0xff]   ;;  %v1162_v7 = vld [vmem:[#allocation5 + $0x28] ss:$16 sps:$4 sm:$0xff]  }
  0x29   :  { %824 = vmatprep.subr.bf16.mxu0 %v1157_v4  ;;  %906 = vmatprep.subr.bf16.mxu1 %v1159_v5  ;;  %v1163_v8 = vld [vmem:[#allocation5 + $0x44] ss:$16 sps:$4 sm:$0xff]   ;;  %v1165_v9 = vld [vmem:[#allocation5 + $0x4c] ss:$16 sps:$4 sm:$0xff]   ;;  %v1167_v10 = vld [vmem:[#allocation5 + $0x40] ss:$16 sps:$4 sm:$0xff]  }
  0x2a   :  { %v1168_v11 = vld [vmem:[#allocation5 + $0x48] ss:$16 sps:$4 sm:$0xff]   ;;  %v1169_v12 = vld [vmem:[#allocation5 + $0x64] ss:$16 sps:$4 sm:$0xff]   ;;  %v1171_v13 = vld [vmem:[#allocation5 + $0x6c] ss:$16 sps:$4 sm:$0xff]  }
  0x2b   :  { %v1173_v14 = vld [vmem:[#allocation5 + $0x60] ss:$16 sps:$4 sm:$0xff]   ;;  %v1174_v15 = vld [vmem:[#allocation5 + $0x68] ss:$16 sps:$4 sm:$0xff]   ;;  %v1175_v16 = vld [vmem:[#allocation5 + $0x84] ss:$16 sps:$4 sm:$0xff]  }
  0x2c   :  { %825 = vmatpush1.bf16.msra.mxu0 %v1161_v6  ;;  %907 = vmatpush1.bf16.msra.mxu1 %v1162_v7  ;;  %v1177_v17 = vld [vmem:[#allocation5 + $0x8c] ss:$16 sps:$4 sm:$0xff]   ;;  %v1179_v18 = vld [vmem:[#allocation5 + $0x80] ss:$16 sps:$4 sm:$0xff]   ;;  %v1180_v19 = vld [vmem:[#allocation5 + $0x88] ss:$16 sps:$4 sm:$0xff]  }
  0x2d   :  { %826 = vmatprep.subr.bf16.mxu0 %v1163_v8  ;;  %908 = vmatprep.subr.bf16.mxu1 %v1165_v9  ;;  %v1181_v20 = vld [vmem:[#allocation5 + $0xa4] ss:$16 sps:$4 sm:$0xff]   ;;  %v1183_v21 = vld [vmem:[#allocation5 + $0xac] ss:$16 sps:$4 sm:$0xff]   ;;  %v1185_v22 = vld [vmem:[#allocation5 + $0xa0] ss:$16 sps:$4 sm:$0xff]  }
  0x2e   :  { %v1186_v23 = vld [vmem:[#allocation5 + $0xa8] ss:$16 sps:$4 sm:$0xff]   ;;  %v1187_v24 = vld [vmem:[#allocation5 + $0xc4] ss:$16 sps:$4 sm:$0xff]   ;;  %v1189_v25 = vld [vmem:[#allocation5 + $0xcc] ss:$16 sps:$4 sm:$0xff]  }
  0x2f   :  { %v1191_v26 = vld [vmem:[#allocation5 + $0xc0] ss:$16 sps:$4 sm:$0xff]   ;;  %v1192_v27 = vld [vmem:[#allocation5 + $0xc8] ss:$16 sps:$4 sm:$0xff]   ;;  %v1193_v28 = vld [vmem:[#allocation5 + $0xe4] ss:$16 sps:$4 sm:$0xff]  }
  0x30   :  { %827 = vmatpush1.bf16.msra.mxu0 %v1167_v10  ;;  %909 = vmatpush1.bf16.msra.mxu1 %v1168_v11  ;;  %v1195_v29 = vld [vmem:[#allocation5 + $0xec] ss:$16 sps:$4 sm:$0xff]   ;;  %v1197_v30 = vld [vmem:[#allocation5 + $0xe0] ss:$16 sps:$4 sm:$0xff]   ;;  %v1198_v31 = vld [vmem:[#allocation5 + $0xe8] ss:$16 sps:$4 sm:$0xff]  }
  0x31   :  { %828 = vmatprep.subr.bf16.mxu0 %v1169_v12  ;;  %910 = vmatprep.subr.bf16.mxu1 %v1171_v13  ;;  %v1199_v32 = vld [vmem:[#allocation5 + $0x104] ss:$16 sps:$4 sm:$0xff]   ;;  %v1201_v33 = vld [vmem:[#allocation5 + $0x10c] ss:$16 sps:$4 sm:$0xff]   ;;  %v1203_v34 = vld [vmem:[#allocation5 + $0x100] ss:$16 sps:$4 sm:$0xff]  }
  0x32   :  { %v1204_v35 = vld [vmem:[#allocation5 + $0x108] ss:$16 sps:$4 sm:$0xff]   ;;  %v1205_v36 = vld [vmem:[#allocation5 + $0x124] ss:$16 sps:$4 sm:$0xff]   ;;  %v1207_v37 = vld [vmem:[#allocation5 + $0x12c] ss:$16 sps:$4 sm:$0xff]  }
  0x33   :  { %v1209_v38 = vld [vmem:[#allocation5 + $0x120] ss:$16 sps:$4 sm:$0xff]   ;;  %v1210_v39 = vld [vmem:[#allocation5 + $0x128] ss:$16 sps:$4 sm:$0xff]   ;;  %v1211_v40 = vld [vmem:[#allocation5 + $0x144] ss:$16 sps:$4 sm:$0xff]  }
  0x34   :  { %829 = vmatpush1.bf16.msra.mxu0 %v1173_v14  ;;  %911 = vmatpush1.bf16.msra.mxu1 %v1174_v15  ;;  %v1213_v41 = vld [vmem:[#allocation5 + $0x14c] ss:$16 sps:$4 sm:$0xff]   ;;  %v1215_v42 = vld [vmem:[#allocation5 + $0x140] ss:$16 sps:$4 sm:$0xff]   ;;  %v1216_v43 = vld [vmem:[#allocation5 + $0x148] ss:$16 sps:$4 sm:$0xff]  }
  0x35   :  { %830 = vmatprep.subr.bf16.mxu0 %v1175_v16  ;;  %912 = vmatprep.subr.bf16.mxu1 %v1177_v17  ;;  %v1217_v44 = vld [vmem:[#allocation5 + $0x164] ss:$16 sps:$4 sm:$0xff]   ;;  %v1219_v45 = vld [vmem:[#allocation5 + $0x16c] ss:$16 sps:$4 sm:$0xff]   ;;  %v1221_v47 = vld [vmem:[#allocation5 + $0x160] ss:$16 sps:$4 sm:$0xff]  }
  0x36   :  { %v38_v46 = vld [vmem:[#allocation2] sm:$0xff]  ;;  %v1222_v49 = vld [vmem:[#allocation5 + $0x168] ss:$16 sps:$4 sm:$0xff]   ;;  %v1225_v51 = vld [vmem:[#allocation5 + $0x18c] ss:$16 sps:$4 sm:$0xff]   ;;  %s1423_s1 = smov [#allocation7]  }
  0x37   :  { %v1007_v48 = vcombine.high %v38_v46, %v38_v46  ;;  %v1223_v50 = vld [vmem:[#allocation5 + $0x184] ss:$16 sps:$4 sm:$0xff]   ;;  %v1227_v52 = vld [vmem:[#allocation5 + $0x180] ss:$16 sps:$4 sm:$0xff]   ;;  %v1228_v53 = vld [vmem:[#allocation5 + $0x188] ss:$16 sps:$4 sm:$0xff]   ;;  %v1006_v4 = vcombine.low %v38_v46, %v38_v46 }
  0x38   :  { %831 = vmatpush1.bf16.msra.mxu0 %v1179_v18  ;;  %913 = vmatpush1.bf16.msra.mxu1 %v1180_v19  ;;  %v1229_v54 = vld [vmem:[#allocation5 + $0x1a4] ss:$16 sps:$4 sm:$0xff]   ;;  %v1231_v55 = vld [vmem:[#allocation5 + $0x1ac] ss:$16 sps:$4 sm:$0xff]   ;;  %v1233_v56 = vld [vmem:[#allocation5 + $0x1a0] ss:$16 sps:$4 sm:$0xff]  }
  0x39   :  { %832 = vmatprep.subr.bf16.mxu0 %v1181_v20  ;;  %914 = vmatprep.subr.bf16.mxu1 %v1183_v21  ;;  %v1234_v57 = vld [vmem:[#allocation5 + $0x1a8] ss:$16 sps:$4 sm:$0xff]   ;;  %v1235_v58 = vld [vmem:[#allocation5 + $0x1c4] ss:$16 sps:$4 sm:$0xff]   ;;  %v1237_v59 = vld [vmem:[#allocation5 + $0x1cc] ss:$16 sps:$4 sm:$0xff]  }
  0x3a   :  { %854 = vmatprep.mubr.bf16.mxu0 %v1007_v48  ;;  %936 = vmatprep.mubr.bf16.mxu1 %v1007_v48  ;;  %v1239_v60 = vld [vmem:[#allocation5 + $0x1c0] ss:$16 sps:$4 sm:$0xff]   ;;  %v1240_v61 = vld [vmem:[#allocation5 + $0x1c8] ss:$16 sps:$4 sm:$0xff]   ;;  %v1241_v62 = vld [vmem:[#allocation5 + $0x1e4] ss:$16 sps:$4 sm:$0xff]  }
  0x3b   :  { %v1243_v63 = vld [vmem:[#allocation5 + $0x1ec] ss:$16 sps:$4 sm:$0xff]   ;;  %v1245_v0 = vld [vmem:[#allocation5 + $0x1e0] ss:$16 sps:$4 sm:$0xff]   ;;  %v1246_v1 = vld [vmem:[#allocation5 + $0x1e8] ss:$16 sps:$4 sm:$0xff]  }
  0x3c   :  { %833 = vmatpush1.bf16.msra.mxu0 %v1185_v22  ;;  %915 = vmatpush1.bf16.msra.mxu1 %v1186_v23  ;;  %v1251_v2 = vld [vmem:[#allocation5 + $0x204] ss:$16 sps:$4 sm:$0xff]   ;;  %v1254_v3 = vld [vmem:[#allocation5 + $0x20c] ss:$16 sps:$4 sm:$0xff]   ;;  %v1249_v5 = vld [vmem:[#allocation5 + $0x200] ss:$16 sps:$4 sm:$0xff]  }
  0x3d   :  { %834 = vmatprep.subr.bf16.mxu0 %v1187_v24  ;;  %916 = vmatprep.subr.bf16.mxu1 %v1189_v25  ;;  %v1252_v6 = vld [vmem:[#allocation5 + $0x208] ss:$16 sps:$4 sm:$0xff]   ;;  %v1257_v7 = vld [vmem:[#allocation5 + $0x224] ss:$16 sps:$4 sm:$0xff]   ;;  %v1260_v8 = vld [vmem:[#allocation5 + $0x22c] ss:$16 sps:$4 sm:$0xff]  }
  0x3e   :  { %v1255_v9 = vld [vmem:[#allocation5 + $0x220] ss:$16 sps:$4 sm:$0xff]   ;;  %v1258_v10 = vld [vmem:[#allocation5 + $0x228] ss:$16 sps:$4 sm:$0xff]   ;;  %v1263_v11 = vld [vmem:[#allocation5 + $0x244] ss:$16 sps:$4 sm:$0xff]  }
  0x3f   :  { %v1266_v12 = vld [vmem:[#allocation5 + $0x24c] ss:$16 sps:$4 sm:$0xff]   ;;  %v1261_v13 = vld [vmem:[#allocation5 + $0x240] ss:$16 sps:$4 sm:$0xff]   ;;  %v1264_v14 = vld [vmem:[#allocation5 + $0x248] ss:$16 sps:$4 sm:$0xff]  }
  0x40   :  { %835 = vmatpush1.bf16.msra.mxu0 %v1191_v26  ;;  %917 = vmatpush1.bf16.msra.mxu1 %v1192_v27  ;;  %v1269_v15 = vld [vmem:[#allocation5 + $0x264] ss:$16 sps:$4 sm:$0xff]   ;;  %v1272_v16 = vld [vmem:[#allocation5 + $0x26c] ss:$16 sps:$4 sm:$0xff]   ;;  %v1267_v17 = vld [vmem:[#allocation5 + $0x260] ss:$16 sps:$4 sm:$0xff]  }
  0x41   :  { %836 = vmatprep.subr.bf16.mxu0 %v1193_v28  ;;  %918 = vmatprep.subr.bf16.mxu1 %v1195_v29  ;;  %v1270_v18 = vld [vmem:[#allocation5 + $0x268] ss:$16 sps:$4 sm:$0xff]   ;;  %v1275_v19 = vld [vmem:[#allocation5 + $0x284] ss:$16 sps:$4 sm:$0xff]   ;;  %v1278_v20 = vld [vmem:[#allocation5 + $0x28c] ss:$16 sps:$4 sm:$0xff]  }
  0x42   :  { %v1273_v21 = vld [vmem:[#allocation5 + $0x280] ss:$16 sps:$4 sm:$0xff]   ;;  %v1276_v22 = vld [vmem:[#allocation5 + $0x288] ss:$16 sps:$4 sm:$0xff]   ;;  %v1281_v23 = vld [vmem:[#allocation5 + $0x2a4] ss:$16 sps:$4 sm:$0xff]  }
  0x43   :  { %v1284_v24 = vld [vmem:[#allocation5 + $0x2ac] ss:$16 sps:$4 sm:$0xff]   ;;  %v1279_v25 = vld [vmem:[#allocation5 + $0x2a0] ss:$16 sps:$4 sm:$0xff]   ;;  %v1282_v26 = vld [vmem:[#allocation5 + $0x2a8] ss:$16 sps:$4 sm:$0xff]  }
  0x44   :  { %837 = vmatpush1.bf16.msra.mxu0 %v1197_v30  ;;  %919 = vmatpush1.bf16.msra.mxu1 %v1198_v31  ;;  %v1287_v27 = vld [vmem:[#allocation5 + $0x2c4] ss:$16 sps:$4 sm:$0xff]   ;;  %v1290_v28 = vld [vmem:[#allocation5 + $0x2cc] ss:$16 sps:$4 sm:$0xff]   ;;  %v1285_v31 = vld [vmem:[#allocation5 + $0x2c0] ss:$16 sps:$4 sm:$0xff]  }
  0x45   :  { %838 = vmatprep.subr.bf16.mxu0 %v1199_v32  ;;  %920 = vmatprep.subr.bf16.mxu1 %v1201_v33  ;;  %v1470_v29 = vld [vmem:[#allocation2 + $0x8] sm:$0xff]  ;;  %v1293_v33 = vld [vmem:[#allocation5 + $0x2e4] ss:$16 sps:$4 sm:$0xff]   ;;  %s996_s6 = sshll.u32 %s1423_s1, 4  ;;  %s997_s6 = int_to_ptr.vmem [resolvable:$true] %s996_s6 }
  0x46   :  { %v1009_v30 = vcombine.high %v1470_v29, %v1470_v29  ;;  %v1288_v32 = vld [vmem:[#allocation5 + $0x2c8] ss:$16 sps:$4 sm:$0xff]   ;;  %v1314_v46 = vld [vmem:[#allocation5 + $0x34c] ss:$16 sps:$4 sm:$0xff]   ;;  %s1391_s7 = scalar_lea.vmem %s997_s6, 512  ;;  %p1396_p3 = scmp.lt.s32.totalorder %s997_s6, %s997_s6 }
  0x47   :  { %v1312_v48 = vld [vmem:[#allocation5 + $0x348] ss:$16 sps:$4 sm:$0xff]   ;;  %p1392_p2 = scmp.ne.s32.totalorder %s997_s6, %s1391_s7  ;;  %p1397_p4 = scmp.lt.s32.totalorder %s1391_s7, %s1391_s7 }
  0x48   :  { %839 = vmatpush1.bf16.msra.mxu0 %v1203_v34  ;;  %921 = vmatpush1.bf16.msra.mxu1 %v1204_v35  ;;  %v1296_v34 = vld [vmem:[#allocation5 + $0x2ec] ss:$16 sps:$4 sm:$0xff]   ;;  %v1291_v35 = vld [vmem:[#allocation5 + $0x2e0] ss:$16 sps:$4 sm:$0xff]  }
  0x49   :  { %840 = vmatprep.subr.bf16.mxu0 %v1205_v36  ;;  %922 = vmatprep.subr.bf16.mxu1 %v1207_v37  ;;  %v1294_v36 = vld [vmem:[#allocation5 + $0x2e8] ss:$16 sps:$4 sm:$0xff]   ;;  %v1299_v37 = vld [vmem:[#allocation5 + $0x304] ss:$16 sps:$4 sm:$0xff]   ;;  %p1398_p5 = por %p1397_p4, %p1396_p3 }
  0x4b   :  { %p1399_p6 = pnand %p1398_p5, %p1392_p2 }
  0x4c   :  { %841 = vmatpush1.bf16.msra.mxu0 %v1209_v38  ;;  %923 = vmatpush1.bf16.msra.mxu1 %v1210_v39  ;;  %v1302_v38 = vld [vmem:[#allocation5 + $0x30c] ss:$16 sps:$4 sm:$0xff]   ;;  %v1297_v39 = vld [vmem:[#allocation5 + $0x300] ss:$16 sps:$4 sm:$0xff]  }
  0x4d   :  { %842 = vmatprep.subr.bf16.mxu0 %v1211_v40  ;;  %924 = vmatprep.subr.bf16.mxu1 %v1213_v41  ;;  %v1300_v40 = vld [vmem:[#allocation5 + $0x308] ss:$16 sps:$4 sm:$0xff]   ;;  %v1305_v41 = vld [vmem:[#allocation5 + $0x324] ss:$16 sps:$4 sm:$0xff]  }
  0x50   :  { %843 = vmatpush1.bf16.msra.mxu0 %v1215_v42  ;;  %925 = vmatpush1.bf16.msra.mxu1 %v1216_v43  ;;  %v1308_v42 = vld [vmem:[#allocation5 + $0x32c] ss:$16 sps:$4 sm:$0xff]   ;;  %v1303_v43 = vld [vmem:[#allocation5 + $0x320] ss:$16 sps:$4 sm:$0xff]  }
  0x51   :  { %844 = vmatprep.subr.bf16.mxu0 %v1217_v44  ;;  %926 = vmatprep.subr.bf16.mxu1 %v1219_v45  ;;  %v1306_v44 = vld [vmem:[#allocation5 + $0x328] ss:$16 sps:$4 sm:$0xff]   ;;  %v1311_v45 = vld [vmem:[#allocation5 + $0x344] ss:$16 sps:$4 sm:$0xff]  }
  0x54   :  { %845 = vmatpush1.bf16.msra.mxu0 %v1221_v47  ;;  %927 = vmatpush1.bf16.msra.mxu1 %v1222_v49  ;;  %v1309_v47 = vld [vmem:[#allocation5 + $0x340] ss:$16 sps:$4 sm:$0xff]   ;;  %v1317_v49 = vld [vmem:[#allocation5 + $0x364] ss:$16 sps:$4 sm:$0xff]  }
  0x55   :  { %846 = vmatprep.subr.bf16.mxu0 %v1223_v50  ;;  %928 = vmatprep.subr.bf16.mxu1 %v1225_v51  ;;  %v1320_v50 = vld [vmem:[#allocation5 + $0x36c] ss:$16 sps:$4 sm:$0xff]   ;;  %v1315_v51 = vld [vmem:[#allocation5 + $0x360] ss:$16 sps:$4 sm:$0xff]  }
  0x58   :  { %847 = vmatpush1.bf16.msra.mxu0 %v1227_v52  ;;  %929 = vmatpush1.bf16.msra.mxu1 %v1228_v53  ;;  %v1318_v52 = vld [vmem:[#allocation5 + $0x368] ss:$16 sps:$4 sm:$0xff]   ;;  %v1323_v53 = vld [vmem:[#allocation5 + $0x384] ss:$16 sps:$4 sm:$0xff]  }
  0x59   :  { %848 = vmatprep.subr.bf16.mxu0 %v1229_v54  ;;  %930 = vmatprep.subr.bf16.mxu1 %v1231_v55  ;;  %v1326_v54 = vld [vmem:[#allocation5 + $0x38c] ss:$16 sps:$4 sm:$0xff]   ;;  %v1321_v55 = vld [vmem:[#allocation5 + $0x380] ss:$16 sps:$4 sm:$0xff]  }
  0x5c   :  { %849 = vmatpush1.bf16.msra.mxu0 %v1233_v56  ;;  %931 = vmatpush1.bf16.msra.mxu1 %v1234_v57  ;;  %v1324_v56 = vld [vmem:[#allocation5 + $0x388] ss:$16 sps:$4 sm:$0xff]   ;;  %v1329_v57 = vld [vmem:[#allocation5 + $0x3a4] ss:$16 sps:$4 sm:$0xff]  }
  0x5d   :  { %850 = vmatprep.subr.bf16.mxu0 %v1235_v58  ;;  %932 = vmatprep.subr.bf16.mxu1 %v1237_v59  ;;  %v1332_v58 = vld [vmem:[#allocation5 + $0x3ac] ss:$16 sps:$4 sm:$0xff]   ;;  %v1327_v59 = vld [vmem:[#allocation5 + $0x3a0] ss:$16 sps:$4 sm:$0xff]  }
  0x60   :  { %851 = vmatpush1.bf16.msra.mxu0 %v1239_v60  ;;  %933 = vmatpush1.bf16.msra.mxu1 %v1240_v61  ;;  %v1330_v60 = vld [vmem:[#allocation5 + $0x3a8] ss:$16 sps:$4 sm:$0xff]   ;;  %v1335_v61 = vld [vmem:[#allocation5 + $0x3c4] ss:$16 sps:$4 sm:$0xff]  }
  0x61   :  { %852 = vmatprep.subr.bf16.mxu0 %v1241_v62  ;;  %934 = vmatprep.subr.bf16.mxu1 %v1243_v63  ;;  %v1338_v62 = vld [vmem:[#allocation5 + $0x3cc] ss:$16 sps:$4 sm:$0xff]   ;;  %v1333_v63 = vld [vmem:[#allocation5 + $0x3c0] ss:$16 sps:$4 sm:$0xff]  }
  0x64   :  { %853 = vmatpush1.bf16.msra.mxu0 %v1245_v0  ;;  %935 = vmatpush1.bf16.msra.mxu1 %v1246_v1  ;;  %v1336_v0 = vld [vmem:[#allocation5 + $0x3c8] ss:$16 sps:$4 sm:$0xff]   ;;  %v1341_v1 = vld [vmem:[#allocation5 + $0x3e4] ss:$16 sps:$4 sm:$0xff]  }
  0x65   :  { %863 = vmatprep.subr.bf16.mxu0 %v1251_v2  ;;  %945 = vmatprep.subr.bf16.mxu1 %v1254_v3  ;;  %v1344_v2 = vld [vmem:[#allocation5 + $0x3ec] ss:$16 sps:$4 sm:$0xff]   ;;  %v1339_v3 = vld [vmem:[#allocation5 + $0x3e0] ss:$16 sps:$4 sm:$0xff]  }
  0x67   :  { %855 = vmatmul.mubr.bf16.vlgmr.msra.gmra.mrb[0].mxu0 %v1006_v4  ;;  %937 = vmatmul.mubr.bf16.vlgmr.msra.gmra.mrb[0].mxu1 %v1006_v4  ;;  %v1342_v4 = vld [vmem:[#allocation5 + $0x3e8] ss:$16 sps:$4 sm:$0xff]  }
  0x68   :  { %864 = vmatpush1.bf16.msra.mxu0 %v1249_v5  ;;  %946 = vmatpush1.bf16.msra.mxu1 %v1252_v6  ;;  %v1008_v5 = vcombine.low %v1470_v29, %v1470_v29 }
  0x69   :  { %865 = vmatprep.subr.bf16.mxu0 %v1257_v7  ;;  %947 = vmatprep.subr.bf16.mxu1 %v1260_v8 }
  0x6a   :  { %895 = vmatprep.mubr.bf16.mxu0 %v1009_v30  ;;  %977 = vmatprep.mubr.bf16.mxu1 %v1009_v30 }
  0x6c   :  { %866 = vmatpush1.bf16.msra.mxu0 %v1255_v9  ;;  %948 = vmatpush1.bf16.msra.mxu1 %v1258_v10 }
  0x6d   :  { %867 = vmatprep.subr.bf16.mxu0 %v1263_v11  ;;  %949 = vmatprep.subr.bf16.mxu1 %v1266_v12 }
  0x70   :  { %868 = vmatpush1.bf16.msra.mxu0 %v1261_v13  ;;  %950 = vmatpush1.bf16.msra.mxu1 %v1264_v14 }
  0x71   :  { %869 = vmatprep.subr.bf16.mxu0 %v1269_v15  ;;  %951 = vmatprep.subr.bf16.mxu1 %v1272_v16 }
  0x74   :  { %870 = vmatpush1.bf16.msra.mxu0 %v1267_v17  ;;  %952 = vmatpush1.bf16.msra.mxu1 %v1270_v18 }
  0x75   :  { %871 = vmatprep.subr.bf16.mxu0 %v1275_v19  ;;  %953 = vmatprep.subr.bf16.mxu1 %v1278_v20 }
  0x78   :  { %872 = vmatpush1.bf16.msra.mxu0 %v1273_v21  ;;  %954 = vmatpush1.bf16.msra.mxu1 %v1276_v22 }
  0x79   :  { %873 = vmatprep.subr.bf16.mxu0 %v1281_v23  ;;  %955 = vmatprep.subr.bf16.mxu1 %v1284_v24 }
  0x7c   :  { %874 = vmatpush1.bf16.msra.mxu0 %v1279_v25  ;;  %956 = vmatpush1.bf16.msra.mxu1 %v1282_v26 }
  0x7d   :  { %875 = vmatprep.subr.bf16.mxu0 %v1287_v27  ;;  %957 = vmatprep.subr.bf16.mxu1 %v1290_v28 }
  0x80   :  { %876 = vmatpush1.bf16.msra.mxu0 %v1285_v31  ;;  %958 = vmatpush1.bf16.msra.mxu1 %v1288_v32 }
  0x81   :  { %877 = vmatprep.subr.bf16.mxu0 %v1293_v33  ;;  %959 = vmatprep.subr.bf16.mxu1 %v1296_v34 }
  0x84   :  { %878 = vmatpush1.bf16.msra.mxu0 %v1291_v35  ;;  %960 = vmatpush1.bf16.msra.mxu1 %v1294_v36 }
  0x85   :  { %879 = vmatprep.subr.bf16.mxu0 %v1299_v37  ;;  %961 = vmatprep.subr.bf16.mxu1 %v1302_v38 }
  0x88   :  { %880 = vmatpush1.bf16.msra.mxu0 %v1297_v39  ;;  %962 = vmatpush1.bf16.msra.mxu1 %v1300_v40 }
  0x89   :  { %881 = vmatprep.subr.bf16.mxu0 %v1305_v41  ;;  %963 = vmatprep.subr.bf16.mxu1 %v1308_v42 }
  0x8c   :  { %882 = vmatpush1.bf16.msra.mxu0 %v1303_v43  ;;  %964 = vmatpush1.bf16.msra.mxu1 %v1306_v44 }
  0x8d   :  { %883 = vmatprep.subr.bf16.mxu0 %v1311_v45  ;;  %965 = vmatprep.subr.bf16.mxu1 %v1314_v46 }
  0x90   :  { %884 = vmatpush1.bf16.msra.mxu0 %v1309_v47  ;;  %966 = vmatpush1.bf16.msra.mxu1 %v1312_v48 }
  0x91   :  { %885 = vmatprep.subr.bf16.mxu0 %v1317_v49  ;;  %967 = vmatprep.subr.bf16.mxu1 %v1320_v50 }
  0x94   :  { %886 = vmatpush1.bf16.msra.mxu0 %v1315_v51  ;;  %968 = vmatpush1.bf16.msra.mxu1 %v1318_v52 }
  0x95   :  { %887 = vmatprep.subr.bf16.mxu0 %v1323_v53  ;;  %969 = vmatprep.subr.bf16.mxu1 %v1326_v54 }
  0x98   :  { %888 = vmatpush1.bf16.msra.mxu0 %v1321_v55  ;;  %970 = vmatpush1.bf16.msra.mxu1 %v1324_v56 }
  0x99   :  { %889 = vmatprep.subr.bf16.mxu0 %v1329_v57  ;;  %971 = vmatprep.subr.bf16.mxu1 %v1332_v58 }
  0x9c   :  { %890 = vmatpush1.bf16.msra.mxu0 %v1327_v59  ;;  %972 = vmatpush1.bf16.msra.mxu1 %v1330_v60 }
  0x9d   :  { %891 = vmatprep.subr.bf16.mxu0 %v1335_v61  ;;  %973 = vmatprep.subr.bf16.mxu1 %v1338_v62 }
  0xa0   :  { %892 = vmatpush1.bf16.msra.mxu0 %v1333_v63  ;;  %974 = vmatpush1.bf16.msra.mxu1 %v1336_v0 }
  0xa1   :  { %893 = vmatprep.subr.bf16.mxu0 %v1341_v1  ;;  %975 = vmatprep.subr.bf16.mxu1 %v1344_v2 }
  0xa4   :  { %894 = vmatpush1.bf16.msra.mxu0 %v1339_v3  ;;  %976 = vmatpush1.bf16.msra.mxu1 %v1342_v4 }
  0xa7   :  { %896 = vmatmul.mubr.bf16.vlgmr.msra.gmra.mrb[0].mxu0 %v1008_v5  ;;  %978 = vmatmul.mubr.bf16.vlgmr.msra.gmra.mrb[0].mxu1 %v1008_v5 }
 0x17a   :  { %v897_v6 = vpop.f32.mrb[0].mxu0  ;;  %v979_v7 = vpop.f32.mrb[0].mxu1 }
 0x17b   :  { %986 = vst [vmem:[#allocation7] sm:$0xff] %v897_v6  ;;  %988 = vst [vmem:[#allocation7 + $0x10] sm:$0xff] %v979_v7  ;;  %v899_v8 = vpop.f32.mrb[1].mxu0  ;;  %v981_v9 = vpop.f32.mrb[1].mxu1 }
 0x17c   :  { %987 = vst [vmem:[#allocation7 + $0x8] sm:$0xff] %v899_v8  ;;  %989 = vst [vmem:[#allocation7 + $0x18] sm:$0xff] %v981_v9  ;;  %v901_v10 = vpop.f32.mrb[2].mxu0  ;;  %v983_v11 = vpop.f32.mrb[2].mxu1 }
 0x17d   :  { %v902_v12 = vpop.f32.mrb[3].mxu0  ;;  %v984_v13 = vpop.f32.mrb[3].mxu1 }
 0x17e   :  { %1402 = shalt.err (!%p1399_p6)
}
 0x17f   :  { %s1403_s10 = scalar_lea.hbm %s1490_s2, 512 }
 0x180   :  { %p1404_p7 = scmp.ne.s32.totalorder %s1490_s2, %s1403_s10  ;;  %p1407_p8 = scmp.lt.u32.totalorder %s1403_s10, %s1490_s2 }
 0x182   :  { %p1409_p9 = pnand %p1407_p8, %p1404_p7 }
 0x184   :  { %1412 = shalt.err (!%p1409_p9)
}
 0x185   :  { %999 = dma.vmem_to_hbm [thread:$0]  %s997_s6, 512, %s1490_s2, [#allocation4]  }
 0x186   :  { %1417 = dma.done.wait [#allocation4], 512  }
 0x187   :  { %1418 = vsyncadd [#allocation4], 4294966784 }
 0x188   :  { %1003 = vsyncpa [#allocation3], 1 }
 0x189   :  { %1004 = vsyncpa [#allocation6], 1 }
 0x18a   :  { %1005 = vsyncpa [#allocation4], 1 }

</bundles_post_ra>
